<compile_context>
chip_gen: v7x
topology: tpu7x:2x2x1
jax: 0.10.0
libtpu: 0.0.40
codegen_flags: <defaults>
</compile_context>

<pallas_src>
import functools

import jax
import jax.numpy as jnp
from jax.experimental import pallas as pl
from jax.experimental.pallas import tpu as pltpu

LANE = 128      # vreg lane width (VMEM layout granularity, last dim)
SUBLANE = 8     # f32 sublane granularity (second-to-last dim)


def _round_up(x, m):
    return (x + m - 1) // m * m


def _encoder_kernel(x_ref, w1_ref, b1_ref, w2_ref, b2_ref, w3_ref, b3_ref, z_ref):
    """Fused 3-layer MLP for one batch tile: (Linear -> ReLU) x 3, all in VMEM."""
    # Hoist bias loads once per grid step.
    b1 = b1_ref[...]
    b2 = b2_ref[...]
    b3 = b3_ref[...]

    h = x_ref[...].astype(jnp.float32)
    h = jnp.maximum(jnp.dot(h, w1_ref[...], preferred_element_type=jnp.float32) + b1, 0.0)
    h = jnp.maximum(jnp.dot(h, w2_ref[...], preferred_element_type=jnp.float32) + b2, 0.0)
    h = jnp.maximum(jnp.dot(h, w3_ref[...], preferred_element_type=jnp.float32) + b3, 0.0)
    z_ref[...] = h.astype(z_ref.dtype)


@functools.partial(jax.jit, static_argnames=("block_batch",))
def encoder_forward(x, w1, b1, w2, b2, w3, b3, *, block_batch=2048):
    batch, in_dim = x.shape
    h1 = w1.shape[1]
    h2 = w2.shape[1]
    lat = w3.shape[1]

    # Biases as (1, features) rows (free reshape inside jit).
    b1 = b1.reshape(1, h1)
    b2 = b2.reshape(1, h2)
    b3 = b3.reshape(1, lat)

    # ---- Batch tiling: choose step count first, then the tile size, so the
    # padding waste is at most SUBLANE-1 rows (never ~2x near a tile boundary).
    batch_8 = _round_up(batch, SUBLANE)
    nb = max(1, pl.cdiv(batch_8, block_batch))
    tb = _round_up(pl.cdiv(batch_8, nb), SUBLANE)
    batch_p = nb * tb

    if batch_p != batch:
        xp = jnp.zeros((batch_p, in_dim), x.dtype).at[:batch].set(x)
    else:
        xp = x

    out_dtype = x.dtype
    x_itm = jnp.dtype(x.dtype).itemsize
    o_itm = jnp.dtype(out_dtype).itemsize

    # ---- VMEM budget (account for internal lane/sublane padding of small dims).
    lane = lambda d: _round_up(d, LANE)
    sub = lambda d: _round_up(d, SUBLANE)
    vmem_needed = (
        2 * tb * lane(in_dim) * x_itm                       # x tile, double-buffered
        + 2 * tb * lane(lat) * o_itm                        # z tile, double-buffered
        + tb * (lane(h1) + lane(h2)) * 4                    # f32 intermediates
        + 2 * 4 * (sub(in_dim) * lane(h1)
                   + sub(h1) * lane(h2)
                   + sub(h2) * lane(lat))                   # resident weights (2x for default buffering)
        + 2 * 4 * SUBLANE * (lane(h1) + lane(h2) + lane(lat))  # resident biases
    )
    # Cap at 48 MiB: leaves headroom on v7x (64 MiB physical VMEM) for Mosaic scratch.
    vmem_limit = int(min(max(vmem_needed + (4 << 20), 32 << 20), 48 << 20))

    # True (unpadded) streamed sizes for the scheduler hint.
    cost = pl.CostEstimate(
        flops=2 * batch_p * (in_dim * h1 + h1 * h2 + h2 * lat),
        transcendentals=0,
        bytes_accessed=(
            batch_p * in_dim * x_itm
            + batch_p * lat * o_itm
            + 4 * (in_dim * h1 + h1 * h2 + h2 * lat + h1 + h2 + lat)
        ),
    )

    # Weights / biases: constant index_map -> fetched once, VMEM-resident.
    resident = lambda shape: pl.BlockSpec(shape, lambda i: (0, 0))

    z_p = pl.pallas_call(
        _encoder_kernel,
        out_shape=jax.ShapeDtypeStruct((batch_p, lat), out_dtype),
        grid=(nb,),
        in_specs=[
            # x tile streams; last dim == full array dim (legal even though < 128).
            pl.BlockSpec((tb, in_dim), lambda i: (i, 0)),
            resident((in_dim, h1)), resident((1, h1)),
            resident((h1, h2)), resident((1, h2)),
            resident((h2, lat)), resident((1, lat)),
        ],
        # Unpadded output: only the real latent lanes are ever written to HBM.
        out_specs=pl.BlockSpec((tb, lat), lambda i: (i, 0)),
        compiler_params=pltpu.CompilerParams(
            dimension_semantics=("parallel",),
            vmem_limit_bytes=vmem_limit,
        ),
        cost_estimate=cost,
    )(xp, w1, b1, w2, b2, w3, b3)

    return z_p[:batch] if batch_p != batch else z_p


def init_linear(key, fan_in, fan_out, dtype=jnp.float32):
    """Deterministic init mimicking torch.nn.Linear's uniform(-1/sqrt(fan_in), ...).

    Weights are stored [in, out] (transposed vs. torch's [out, in]) once here,
    so the jitted forward does x @ W with no per-call transpose/pad copies.
    """
    kw, kb = jax.random.split(key)
    bound = 1.0 / jnp.sqrt(jnp.asarray(fan_in, dtype))
    w = jax.random.uniform(kw, (fan_in, fan_out), dtype, -bound, bound)
    b = jax.random.uniform(kb, (1, fan_out), dtype, -bound, bound)
    return w, b


def reference_forward(x, w1, b1, w2, b2, w3, b3):
    h = jnp.maximum(x @ w1 + b1, 0.0)
    h = jnp.maximum(h @ w2 + b2, 0.0)
    return jnp.maximum(h @ w3 + b3, 0.0)


if __name__ == "__main__":
    # Encoder(input_dim=32, hidden_dims=[64, 32], latent_dim=16)
    input_dim, hidden_dims, latent_dim = 32, [64, 32], 16

    key = jax.random.PRNGKey(0)
    kx, k1, k2, k3, kx2, kx3 = jax.random.split(key, 6)

    w1, b1 = init_linear(k1, input_dim, hidden_dims[0])
    w2, b2 = init_linear(k2, hidden_dims[0], hidden_dims[1])
    w3, b3 = init_linear(k3, hidden_dims[1], latent_dim)

    # Small batch: single grid step, no padding anywhere.
    batch = 8
    x = jax.random.normal(kx, (batch, input_dim), jnp.float32)
    z = jax.block_until_ready(encoder_forward(x, w1, b1, w2, b2, w3, b3))
    z_ref = reference_forward(x, w1, b1, w2, b2, w3, b3)
    assert z.shape == (batch, latent_dim)
    assert jnp.allclose(z, z_ref, atol=1e-5, rtol=1e-5)

    # Larger batch, forced multi-step grid: exercises pipelined streaming and
    # the "choose nb first" tiling (520 rows -> 5 tiles of 104, zero waste).
    batch2 = 520
    x2 = jax.random.normal(kx2, (batch2, input_dim), jnp.float32)
    z2 = jax.block_until_ready(
        encoder_forward(x2, w1, b1, w2, b2, w3, b3, block_batch=128))
    z2_ref = reference_forward(x2, w1, b1, w2, b2, w3, b3)
    assert z2.shape == (batch2, latent_dim)
    assert jnp.allclose(z2, z2_ref, atol=1e-5, rtol=1e-5)

    # Non-sublane-multiple batch: exercises the row-padding + row-slice path.
    batch3 = 13
    x3 = jax.random.normal(kx3, (batch3, input_dim), jnp.float32)
    z3 = jax.block_until_ready(encoder_forward(x3, w1, b1, w2, b2, w3, b3))
    z3_ref = reference_forward(x3, w1, b1, w2, b2, w3, b3)
    assert z3.shape == (batch3, latent_dim)
    assert jnp.allclose(z3, z3_ref, atol=1e-5, rtol=1e-5)

    print("KERNEL_OK")
</pallas_src>

<mosaic_0001>
module attributes {stable_mosaic.version = 11 : i64} {
  func.func @_encoder_kernel(%arg0: i32, %arg1: memref<8x32xf32, #tpu.memory_space<vmem>>, %arg2: memref<32x64xf32, #tpu.memory_space<vmem>>, %arg3: memref<1x64xf32, #tpu.memory_space<vmem>>, %arg4: memref<64x32xf32, #tpu.memory_space<vmem>>, %arg5: memref<1x32xf32, #tpu.memory_space<vmem>>, %arg6: memref<32x16xf32, #tpu.memory_space<vmem>>, %arg7: memref<1x16xf32, #tpu.memory_space<vmem>>, %arg8: memref<8x16xf32, #tpu.memory_space<vmem>>) attributes {dimension_semantics = [#tpu.dimension_semantics<parallel>], iteration_bounds = array<i64: 1>, scalar_prefetch = 0 : i64, scratch_operands = 0 : i64, tpu.core_type = #tpu.core_type<tc>, window_params = [{transform_indices = @transform_0, window_bounds = array<i64: 8, 32>}, {pipeline_mode = #tpu.pipeline_mode<synchronous>, transform_indices = @transform_1, window_bounds = array<i64: 32, 64>}, {pipeline_mode = #tpu.pipeline_mode<synchronous>, transform_indices = @transform_2, window_bounds = array<i64: 1, 64>}, {pipeline_mode = #tpu.pipeline_mode<synchronous>, transform_indices = @transform_3, window_bounds = array<i64: 64, 32>}, {pipeline_mode = #tpu.pipeline_mode<synchronous>, transform_indices = @transform_4, window_bounds = array<i64: 1, 32>}, {pipeline_mode = #tpu.pipeline_mode<synchronous>, transform_indices = @transform_5, window_bounds = array<i64: 32, 16>}, {pipeline_mode = #tpu.pipeline_mode<synchronous>, transform_indices = @transform_6, window_bounds = array<i64: 1, 16>}, {transform_indices = @transform_7, window_bounds = array<i64: 8, 16>}]} {
    %c0 = arith.constant 0 : index
    %c0_0 = arith.constant 0 : index
    %0 = vector.load %arg3[%c0, %c0_0] : memref<1x64xf32, #tpu.memory_space<vmem>>, vector<1x64xf32>
    %c0_1 = arith.constant 0 : index
    %c0_2 = arith.constant 0 : index
    %1 = vector.load %arg5[%c0_1, %c0_2] : memref<1x32xf32, #tpu.memory_space<vmem>>, vector<1x32xf32>
    %c0_3 = arith.constant 0 : index
    %c0_4 = arith.constant 0 : index
    %2 = vector.load %arg7[%c0_3, %c0_4] : memref<1x16xf32, #tpu.memory_space<vmem>>, vector<1x16xf32>
    %c0_5 = arith.constant 0 : index
    %c0_6 = arith.constant 0 : index
    %3 = vector.load %arg1[%c0_5, %c0_6] : memref<8x32xf32, #tpu.memory_space<vmem>>, vector<8x32xf32>
    %c0_7 = arith.constant 0 : index
    %c0_8 = arith.constant 0 : index
    %4 = vector.load %arg2[%c0_7, %c0_8] : memref<32x64xf32, #tpu.memory_space<vmem>>, vector<32x64xf32>
    %cst = arith.constant dense<0.000000e+00> : vector<8x64xf32>
    %5 = tpu.matmul %3, %4, %cst {dimension_numbers = #tpu.dot_dimension_numbers<[1], [0], [0], [1], [0, 0, 1, 1], [], []>} : vector<8x32xf32>, vector<32x64xf32>, vector<8x64xf32> -> vector<8x64xf32>
    %6 = vector.broadcast %0 : vector<1x64xf32> to vector<8x64xf32>
    %7 = arith.addf %5, %6 : vector<8x64xf32>
    %cst_9 = arith.constant 0.000000e+00 : f32
    %8 = vector.broadcast %cst_9 : f32 to vector<8x64xf32>
    %9 = arith.maximumf %7, %8 : vector<8x64xf32>
    %c0_10 = arith.constant 0 : index
    %c0_11 = arith.constant 0 : index
    %10 = vector.load %arg4[%c0_10, %c0_11] : memref<64x32xf32, #tpu.memory_space<vmem>>, vector<64x32xf32>
    %cst_12 = arith.constant dense<0.000000e+00> : vector<8x32xf32>
    %11 = tpu.matmul %9, %10, %cst_12 {dimension_numbers = #tpu.dot_dimension_numbers<[1], [0], [0], [1], [0, 0, 1, 1], [], []>} : vector<8x64xf32>, vector<64x32xf32>, vector<8x32xf32> -> vector<8x32xf32>
    %12 = vector.broadcast %1 : vector<1x32xf32> to vector<8x32xf32>
    %13 = arith.addf %11, %12 : vector<8x32xf32>
    %cst_13 = arith.constant 0.000000e+00 : f32
    %14 = vector.broadcast %cst_13 : f32 to vector<8x32xf32>
    %15 = arith.maximumf %13, %14 : vector<8x32xf32>
    %c0_14 = arith.constant 0 : index
    %c0_15 = arith.constant 0 : index
    %16 = vector.load %arg6[%c0_14, %c0_15] : memref<32x16xf32, #tpu.memory_space<vmem>>, vector<32x16xf32>
    %cst_16 = arith.constant dense<0.000000e+00> : vector<8x16xf32>
    %17 = tpu.matmul %15, %16, %cst_16 {dimension_numbers = #tpu.dot_dimension_numbers<[1], [0], [0], [1], [0, 0, 1, 1], [], []>} : vector<8x32xf32>, vector<32x16xf32>, vector<8x16xf32> -> vector<8x16xf32>
    %18 = vector.broadcast %2 : vector<1x16xf32> to vector<8x16xf32>
    %19 = arith.addf %17, %18 : vector<8x16xf32>
    %cst_17 = arith.constant 0.000000e+00 : f32
    %20 = vector.broadcast %cst_17 : f32 to vector<8x16xf32>
    %21 = arith.maximumf %19, %20 : vector<8x16xf32>
    %c0_18 = arith.constant 0 : index
    %c0_19 = arith.constant 0 : index
    %22 = vector.load %arg8[%c0_18, %c0_19] : memref<8x16xf32, #tpu.memory_space<vmem>>, vector<8x16xf32>
    tpu.vector_store %arg8[%c0_18, %c0_19], %21 {strides = array<i32>} : memref<8x16xf32, #tpu.memory_space<vmem>>, vector<8x16xf32>,
    return
  }
  func.func @transform_0(%arg0: i32) -> (i32, i32) {
    %c0_i32 = arith.constant 0 : i32
    %c0_i32_0 = arith.constant 0 : i32
    return %arg0, %c0_i32 : i32, i32
  }
  func.func @transform_1(%arg0: i32) -> (i32, i32) {
    %c0_i32 = arith.constant 0 : i32
    %c0_i32_0 = arith.constant 0 : i32
    %c0_i32_1 = arith.constant 0 : i32
    return %c0_i32, %c0_i32_0 : i32, i32
  }
  func.func @transform_2(%arg0: i32) -> (i32, i32) {
    %c0_i32 = arith.constant 0 : i32
    %c0_i32_0 = arith.constant 0 : i32
    %c0_i32_1 = arith.constant 0 : i32
    return %c0_i32, %c0_i32_0 : i32, i32
  }
  func.func @transform_3(%arg0: i32) -> (i32, i32) {
    %c0_i32 = arith.constant 0 : i32
    %c0_i32_0 = arith.constant 0 : i32
    %c0_i32_1 = arith.constant 0 : i32
    return %c0_i32, %c0_i32_0 : i32, i32
  }
  func.func @transform_4(%arg0: i32) -> (i32, i32) {
    %c0_i32 = arith.constant 0 : i32
    %c0_i32_0 = arith.constant 0 : i32
    %c0_i32_1 = arith.constant 0 : i32
    return %c0_i32, %c0_i32_0 : i32, i32
  }
  func.func @transform_5(%arg0: i32) -> (i32, i32) {
    %c0_i32 = arith.constant 0 : i32
    %c0_i32_0 = arith.constant 0 : i32
    %c0_i32_1 = arith.constant 0 : i32
    return %c0_i32, %c0_i32_0 : i32, i32
  }
  func.func @transform_6(%arg0: i32) -> (i32, i32) {
    %c0_i32 = arith.constant 0 : i32
    %c0_i32_0 = arith.constant 0 : i32
    %c0_i32_1 = arith.constant 0 : i32
    return %c0_i32, %c0_i32_0 : i32, i32
  }
  func.func @transform_7(%arg0: i32) -> (i32, i32) {
    %c0_i32 = arith.constant 0 : i32
    %c0_i32_0 = arith.constant 0 : i32
    return %arg0, %c0_i32 : i32, i32
  }
}

</mosaic_0001>

<bundles_post_ra>
// kernel: encoder_forward.1
= control target key start
LH: loop header
LB: loop body
LE: loop exit
PB: predicated region body
PF: predicated region fallthrough
CT: control target
= control target key end

     0   :  { %v423_v3 = vmov 0.0|0.0   ;;  %vm424_vm0 = vmmov 0   ;;  %v425_v6 = vmov 0.0   ;;  %s544_s0 = inlined_call_operand.vmem [shape: f32[8,32], index: 0, kind: input, shape index: {}]   ;;  %s545_s1 = inlined_call_operand.vmem [shape: f32[32,64], index: 1, kind: input, shape index: {}]   ;;  %s546_s2 = inlined_call_operand.vmem [shape: f32[1,64], index: 2, kind: input, shape index: {}]   ;;  %s547_s3 = inlined_call_operand.vmem [shape: f32[64,32], index: 3, kind: input, shape index: {}]   ;;  %s548_s4 = inlined_call_operand.vmem [shape: f32[1,32], index: 4, kind: input, shape index: {}]   ;;  %s549_s5 = inlined_call_operand.vmem [shape: f32[32,16], index: 5, kind: input, shape index: {}]   ;;  %s550_s6 = inlined_call_operand.vmem [shape: f32[1,16], index: 6, kind: input, shape index: {}]   ;;  %s551_s7 = inlined_call_operand.hbm [shape: f32[8,16], index: 7, kind: output, shape index: {}]  }
   0x1   :  { %v31_v0 = vld [vmem:[%s545_s1] sm:$0xff]  ;;  %v32_v1 = vld [vmem:[%s545_s1 + $0x8] sm:$0xff]  ;;  %v33_v2 = vld [vmem:[%s545_s1 + $0x10] sm:$0xff]  ;;  %371 = vmatprep.subr.bf16.mxu0 %v423_v3  ;;  %338 = vmatprep.mubr.msk.f32.mxu0 %vm424_vm0, %v425_v6 }
   0x2   :  { %v372_v4 = vpack.c.bf16 %v32_v1, %v31_v0  ;;  %v34_v5 = vld [vmem:[%s545_s1 + $0x18] sm:$0xff]  ;;  %v116_v7 = vld [vmem:[%s547_s3] sm:$0xff]  ;;  %377 = vmatprep.subr.bf16.mxu1 %v423_v3  ;;  %v117_v8 = vld [vmem:[%s547_s3 + $0x8] sm:$0xff]  ;;  %357 = vmatprep.mubr.msk.f32.mxu1 %vm424_vm0, %v425_v6 }
   0x3   :  { %v118_v9 = vld [vmem:[%s547_s3 + $0x10] sm:$0xff]  ;;  %v119_v10 = vld [vmem:[%s547_s3 + $0x18] sm:$0xff]  ;;  %v375_v11 = vpack.c.bf16 %v34_v5, %v33_v2  ;;  %v378_v12 = vpack.c.bf16 %v117_v8, %v116_v7 }
   0x4   :  { %373 = vmatpush3.bf16.msra.mxu0 %v372_v4 }
   0x5   :  { %374 = vmatprep.subr.bf16.mxu0 %v423_v3 }
   0x6   :  { %12 = vsyncpa [#allocation3], 0  ;;  %379 = vmatpush3.bf16.msra.mxu1 %v378_v12  ;;  %v381_v13 = vpack.c.bf16 %v119_v10, %v118_v9  ;;  %v120_v14 = vld [vmem:[%s547_s3 + $0x20] sm:$0xff]  ;;  %v121_v15 = vld [vmem:[%s547_s3 + $0x28] sm:$0xff]  ;;  %vm41_vm1 = vcmask 261120   ;;  %vm130_vm2 = vcmask 523264  }
   0x7   :  { %380 = vmatprep.subr.bf16.mxu1 %v423_v3  ;;  %v30_v16 = vld [vmem:[%s544_s0] sm:$0xff]  ;;  %v384_v17 = vpack.c.bf16 %v121_v15, %v120_v14  ;;  %v122_v18 = vld [vmem:[%s547_s3 + $0x30] sm:$0xff]  ;;  %v123_v19 = vld [vmem:[%s547_s3 + $0x38] sm:$0xff]  ;;  %s426_s14 = smov [#allocation2]   ;;  %vm289_vm3 = vcmask 130048  }
   0x8   :  { %376 = vmatpush3.bf16.msra.mxu0 %v375_v11  ;;  %v387_v20 = vpack.c.bf16 %v123_v19, %v122_v18  ;;  %v205_v21 = vld [vmem:[%s549_s5] sm:$0xff]  ;;  %v206_v22 = vld [vmem:[%s549_s5 + $0x8] sm:$0xff]  ;;  %v207_v29 = vld [vmem:[%s549_s5 + $0x10] sm:$0xff]  ;;  %s297_s15 = sshll.u32 %s426_s14, 4  ;;  %s298_s15 = int_to_ptr.vmem [resolvable:$true] %s297_s15 }
   0x9   :  { %389 = vmatprep.subr.bf16.mxu0 %v423_v3  ;;  %v390_v23 = vpack.c.bf16 %v206_v22, %v205_v21  ;;  %v305_v24 = vld [vmem:[%s546_s2] ss:$0 sm:$0xff]  ;;  %v208_v30 = vld [vmem:[%s549_s5 + $0x18] sm:$0xff]  ;;  %p404_p1 = scmp.lt.s32.totalorder %s298_s15, %s298_s15 }
   0xa   :  { %382 = vmatpush3.bf16.msra.mxu1 %v381_v13  ;;  %v393_v31 = vpack.c.bf16 %v208_v30, %v207_v29  ;;  %v307_v32 = vld [vmem:[%s548_s4] ss:$0 sm:$0xff]  ;;  %s399_s4 = scalar_lea.vmem %s298_s15, 128 }
   0xb   :  { %339 = vmatmul.mubr.msk.f32.vlgmr.msra.gmra.mrb[0].mxu0 %vm41_vm1, %v30_v16  ;;  %383 = vmatprep.subr.bf16.mxu1 %v423_v3  ;;  %v309_v37 = vld [vmem:[%s550_s6] ss:$0 sm:$0xff]  ;;  %p400_p0 = scmp.ne.s32.totalorder %s298_s15, %s399_s4  ;;  %p405_p2 = scmp.lt.s32.totalorder %s399_s4, %s399_s4 }
   0xc   :  { %368 = vmatprep.mubr.msk.f32.mxu0 %vm424_vm0, %v425_v6  ;;  %391 = vmatpush3.bf16.msra.mxu0 %v390_v23 }
   0xd   :  { %392 = vmatprep.subr.bf16.mxu0 %v423_v3  ;;  %p406_p3 = por %p405_p2, %p404_p1 }
   0xe   :  { %385 = vmatpush3.bf16.msra.mxu1 %v384_v17 }
   0xf   :  { %386 = vmatprep.subr.bf16.mxu1 %v423_v3  ;;  %p407_p4 = pnand %p406_p3, %p400_p0 }
  0x10   :  { %394 = vmatpush3.bf16.msra.mxu0 %v393_v31 }
  0x12   :  { %388 = vmatpush3.bf16.msra.mxu1 %v387_v20 }
  0xde   :  { %v111_v25 = vpop.f32.mrb[0].mxu0 }
  0xdf   :  { %v112_v26 = vadd.f32 %v305_v24, %v111_v25  ;;  %v340_v27 = vpop.f32.mrb[1].mxu0 }
  0xe1   :  { %v115_v28 = vmax.f32 %v112_v26, 0.0 }
  0xe3   :  { %358 = vmatmul.mubr.msk.f32.vlgmr.msra.gmra.mrb[0].mxu1 %vm130_vm2, %v115_v28 }
 0x1b6   :  { %v200_v33 = vpop.f32.mrb[0].mxu1 }
 0x1b7   :  { %v201_v34 = vadd.f32 %v307_v32, %v200_v33  ;;  %v359_v35 = vpop.f32.mrb[1].mxu1 }
 0x1b9   :  { %v204_v36 = vmax.f32 %v201_v34, 0.0 }
 0x1bb   :  { %369 = vmatmul.mubr.msk.f32.vlgmr.msra.gmra.mrb[2].mxu0 %vm41_vm1, %v204_v36 }
 0x28e   :  { %v284_v38 = vpop.f32.mrb[2].mxu0 }
 0x28f   :  { %v285_v39 = vadd.f32 %v309_v37, %v284_v38  ;;  %v370_v40 = vpop.f32.mrb[3].mxu0 }
 0x291   :  { %v288_v41 = vmax.f32 %v285_v39, 0.0 }
 0x293   :  { %290 = vst.msk [vmem:[#allocation2] sm:$0xff] %vm289_vm3, %v288_v41 }
 0x294   :  { %410 = shalt.err (!%p407_p4)
}
 0x295   :  { %s411_s6 = scalar_lea.hbm %s551_s7, 128 }
 0x296   :  { %p412_p5 = scmp.ne.s32.totalorder %s551_s7, %s411_s6  ;;  %p415_p6 = scmp.lt.u32.totalorder %s411_s6, %s551_s7 }
 0x298   :  { %p417_p7 = pnand %p415_p6, %p412_p5 }
 0x29a   :  { %420 = shalt.err (!%p417_p7)
}
 0x29b   :  { %300 = dma.vmem_to_hbm [thread:$0]  %s298_s15, 128, %s551_s7, [#allocation3]  }
 0x29c   :  { %421 = dma.done.wait [#allocation3], 128  }
 0x29d   :  { %422 = vsyncadd [#allocation3], 4294967168 }
 0x29e   :  { %304 = vsyncpa [#allocation3], 1 }

</bundles_post_ra>
